<compile_context>
chip_gen: v6e
topology: v6e:2x2x1
jax: 0.10.0
libtpu: 0.0.40
codegen_flags: <defaults>
</compile_context>

<pallas_src>
import jax
import jax.numpy as jnp
import numpy as np
from jax.experimental import pallas as pl
from jax.experimental.pallas import tpu as pltpu

# Finite-difference Laplace stencils, (taps, pad) exactly as in the torch module.
_KERNELS = {
    '2': (np.array([1.0, -2.0, 1.0]), 0),
    '4': (np.array([-1 / 12, 4 / 3, -5 / 2, 4 / 3, -1 / 12]), 1),
    '6': (np.array([1 / 90, -3 / 20, 3 / 2, -49 / 18, 3 / 2, -3 / 20, 1 / 90]), 2),
    '8': (np.array([-1 / 560, 8 / 315, -1 / 5, 8 / 5, -205 / 72,
                    8 / 5, -1 / 5, 8 / 315, -1 / 560]), 3),
}


def _choose_row_tile(R, L, itemsize=4):
    """Row tile: dtype-aware sublane rounding, ~1 MiB of f32 work per buffer,
    capped so the grid has >= 2 steps whenever the row count allows (v7x)."""
    sub = {1: 32, 2: 16, 4: 8}.get(int(itemsize), 8)
    # Budget in f32-element terms (in-kernel upcast + intermediates dominate VMEM,
    # not the raw DMA bytes), so bf16 inputs don't end up with 2x-too-big tiles.
    target_elems = 256 * 1024                       # ~1 MiB of f32 per tile buffer
    rows = max(sub, (target_elems // max(1, L)) // sub * sub)
    if R >= 2 * sub:                                # keep >= 2 grid steps (dual-TC v7x)
        half = max(sub, (((R + 1) // 2) // sub) * sub)
        rows = min(rows, half)
    if rows >= R:
        return R                                    # one full block (tiny problems)
    return max(sub, (rows // sub) * sub)


def make_laplace_loss_1d(B, C, L, kernel='6', dx=1.0, row_tile=None, dtype=jnp.float32):
    del dx  # stored by the torch module but never used in forward() -> faithful no-op
    taps_np, pad = _KERNELS[kernel]
    n_taps = len(taps_np)
    half = pad + 1                    # stencil half-width; tap index `half` is the center
    R = B * C
    assert L >= 20 and L > 2 * (pad + 1), "masks assume L >= 20 (matches torch slicing)"

    # Static normalization (uses the *original* R even if the last tile is ragged).
    w_lap = 1.0 / float(R * L)            # == (1/C) * sum_c MSE_c
    w_edge = 0.1 * C / float(R * 10)      # 0.1*C*(MSE_start + MSE_end), each over R*10 elems
    s = float(np.sqrt(w_lap))             # folded into taps and the temp_y mask row
    taps_s = [float(t) * s for t in taps_np]

    # Precomputed per-column mask / weight rows (one (8, L) f32 block, VMEM-resident):
    #   0: mask for the leftmost tap  (col >= pad+1)   -> conv's padding=1 zero at x[-1]
    #   1: mask for the rightmost tap (col <= L-2-pad) -> conv's padding=1 zero at x[L]
    #   2: lap gate: 1 inside [pad, L-pad), 0 outside  -> the F.pad(...,(pad,pad)) zeros
    #   3: sqrt(w_lap) inside [10, L-10), 0 outside    -> scaled temp_y mask
    #   4: w_edge on cols [0,10) U [L-10, L), 0 else   -> folded edge-MSE weight
    col = np.arange(L)
    mask_rows = np.zeros((8, L), np.float32)
    mask_rows[0] = (col >= pad + 1).astype(np.float32)
    mask_rows[1] = (col <= L - 2 - pad).astype(np.float32)
    mask_rows[2] = ((col >= pad) & (col < L - pad)).astype(np.float32)
    mask_rows[3] = np.where((col >= 10) & (col < L - 10), s, 0.0).astype(np.float32)
    mask_rows[4] = np.where((col < 10) | (col >= L - 10), w_edge, 0.0).astype(np.float32)
    mask_rows = jnp.asarray(mask_rows)

    TR = row_tile or _choose_row_tile(R, L, jnp.dtype(dtype).itemsize)
    grid = (pl.cdiv(R, TR),)
    ragged = (R % TR) != 0            # static: ragged last tile handled in-kernel (no jnp.pad)

    def kernel_body(m_ref, yp_ref, y_ref, out_ref):
        yp = yp_ref[...].astype(jnp.float32)
        y = y_ref[...].astype(jnp.float32)
        tr = yp.shape[0]

        mrows = m_ref[...]                         # (8, L), tiny, resident
        m_left, m_right = mrows[0:1, :], mrows[1:2, :]
        gate, interior, edge_w = mrows[2:3, :], mrows[3:4, :], mrows[4:5, :]

        # "Same" cross-correlation with the symmetric stencil (taps pre-scaled by
        # sqrt(w_lap)); circular rolls ride the XLU slot; only the outermost tap
        # pair can wrap into surviving positions, so only it is masked.
        lap = jnp.float32(taps_s[half]) * yp
        for d in range(1, half + 1):
            left = pltpu.roll(yp, shift=d, axis=1)            # x[i-d]
            right = pltpu.roll(yp, shift=(L - d) % L, axis=1)  # x[i+d]
            if d == half:
                left = left * m_left
                right = right * m_right
            lap = lap + jnp.float32(taps_s[half - d]) * (left + right)

        # gate reproduces F.pad's zeroed ends; interior = sqrt(w_lap)*[10,L-10) mask.
        d_lap = lap * gate - y * interior
        de = yp - y
        contrib = d_lap * d_lap + edge_w * (de * de)

        if ragged:
            # Zero contributions from the out-of-range rows of the last tile
            # (their block contents are unspecified; where() never propagates them).
            ridx = jax.lax.broadcasted_iota(jnp.int32, (tr, 1), 0) + pl.program_id(0) * TR
            contrib = jnp.where(ridx < R, contrib, 0.0)

        # Sublane-only reduce -> lane-dense (1,1,L) partial; no cross-lane reduce here.
        out_ref[...] = jnp.sum(contrib, axis=0, keepdims=True).reshape(1, 1, L)

    itemsize = jnp.dtype(dtype).itemsize
    cost = pl.CostEstimate(
        flops=22 * R * L,
        transcendentals=0,
        bytes_accessed=2 * R * L * itemsize + 8 * L * 4 + grid[0] * L * 4,
    )

    @jax.jit
    def loss_fn(y_pred, y):
        # Native dtype straight to VMEM; upcast happens per-tile in the kernel.
        yp2 = y_pred.reshape(R, L)
        y2 = y.reshape(R, L)

        partials = pl.pallas_call(
            kernel_body,
            out_shape=jax.ShapeDtypeStruct((grid[0], 1, L), jnp.float32),
            grid_spec=pltpu.PrefetchScalarGridSpec(
                num_scalar_prefetch=0,
                grid=grid,
                in_specs=[pl.BlockSpec((8, L), lambda i: (0, 0)),     # masks: constant block
                          pl.BlockSpec((TR, L), lambda i: (i, 0)),
                          pl.BlockSpec((TR, L), lambda i: (i, 0))],
                out_specs=pl.BlockSpec((1, 1, L), lambda i: (i, 0, 0)),
            ),
            compiler_params=pltpu.CompilerParams(
                dimension_semantics=("parallel",)),
            cost_estimate=cost,
        )(mask_rows, yp2, y2)
        return jnp.sum(partials)

    return loss_fn


def ref_loss(y_pred, y, kernel='6'):
    # Pure-JAX reference mirroring the PyTorch forward.
    taps_np, pad = _KERNELS[kernel]
    taps = jnp.asarray(taps_np, jnp.float32)
    B, C, L = y_pred.shape
    n = taps.shape[0]
    cp = (n - 1) // 2
    yp_pad = jnp.pad(y_pred, ((0, 0), (0, 0), (cp, cp)))
    lap = sum(taps[k] * yp_pad[:, :, k:k + L] for k in range(n))
    col = jnp.arange(L)
    lap = jnp.where((col >= pad) & (col < L - pad), lap, 0.0)
    temp_y = jnp.where((col >= 10) & (col < L - 10), y, 0.0)
    mse_lap = jnp.mean((lap - temp_y) ** 2)
    mse_s = jnp.mean((y_pred[:, :, :10] - y[:, :, :10]) ** 2)
    mse_e = jnp.mean((y_pred[:, :, -10:] - y[:, :, -10:]) ** 2)
    return mse_lap + 0.1 * C * (mse_s + mse_e)


if __name__ == "__main__":
    B, C, L = 2, 4, 128
    key = jax.random.PRNGKey(0)
    k1, k2 = jax.random.split(key)
    y_pred = jax.random.normal(k1, (B, C, L), dtype=jnp.float32)
    y = jax.random.normal(k2, (B, C, L), dtype=jnp.float32)

    loss_fn = make_laplace_loss_1d(B, C, L, kernel='6', dtype=jnp.float32)
    out = loss_fn(y_pred, y)
    jax.block_until_ready(out)

    ref = ref_loss(y_pred, y, '6')
    np.testing.assert_allclose(np.asarray(out), np.asarray(ref), rtol=1e-5, atol=1e-6)
    print("KERNEL_OK")
</pallas_src>

<mosaic_0001>
module attributes {stable_mosaic.version = 11 : i64} {
  func.func @kernel_body(%arg0: i32, %arg1: memref<8x128xf32, #tpu.memory_space<vmem>>, %arg2: memref<8x128xf32, #tpu.memory_space<vmem>>, %arg3: memref<8x128xf32, #tpu.memory_space<vmem>>, %arg4: memref<1x1x128xf32, #tpu.memory_space<vmem>>) attributes {dimension_semantics = [#tpu.dimension_semantics<parallel>], iteration_bounds = array<i64: 1>, scalar_prefetch = 0 : i64, scratch_operands = 0 : i64, tpu.core_type = #tpu.core_type<tc>, window_params = [{pipeline_mode = #tpu.pipeline_mode<synchronous>, transform_indices = @transform_0, window_bounds = array<i64: 8, 128>}, {transform_indices = @transform_1, window_bounds = array<i64: 8, 128>}, {transform_indices = @transform_2, window_bounds = array<i64: 8, 128>}, {transform_indices = @transform_3, window_bounds = array<i64: 1, 1, 128>}]} {
    %c0 = arith.constant 0 : index
    %c0_0 = arith.constant 0 : index
    %0 = vector.load %arg2[%c0, %c0_0] : memref<8x128xf32, #tpu.memory_space<vmem>>, vector<8x128xf32>
    %c0_1 = arith.constant 0 : index
    %c0_2 = arith.constant 0 : index
    %1 = vector.load %arg3[%c0_1, %c0_2] : memref<8x128xf32, #tpu.memory_space<vmem>>, vector<8x128xf32>
    %c0_3 = arith.constant 0 : index
    %c0_4 = arith.constant 0 : index
    %2 = vector.load %arg1[%c0_3, %c0_4] : memref<8x128xf32, #tpu.memory_space<vmem>>, vector<8x128xf32>
    %3 = vector.extract_strided_slice %2 {offsets = [0, 0], sizes = [1, 128], strides = [1, 1]} : vector<8x128xf32> to vector<1x128xf32>
    %4 = vector.extract_strided_slice %2 {offsets = [1, 0], sizes = [1, 128], strides = [1, 1]} : vector<8x128xf32> to vector<1x128xf32>
    %5 = vector.extract_strided_slice %2 {offsets = [2, 0], sizes = [1, 128], strides = [1, 1]} : vector<8x128xf32> to vector<1x128xf32>
    %6 = vector.extract_strided_slice %2 {offsets = [3, 0], sizes = [1, 128], strides = [1, 1]} : vector<8x128xf32> to vector<1x128xf32>
    %7 = vector.extract_strided_slice %2 {offsets = [4, 0], sizes = [1, 128], strides = [1, 1]} : vector<8x128xf32> to vector<1x128xf32>
    %cst = arith.constant -0.0850694477 : f32
    %8 = vector.broadcast %cst : f32 to vector<8x128xf32>
    %9 = arith.mulf %8, %0 : vector<8x128xf32>
    %c1_i32 = arith.constant 1 : i32
    %10 = tpu.dynamic_rotate %0 by %c1_i32 dim 1 : vector<8x128xf32>, i32 -> vector<8x128xf32>
    %c127_i32 = arith.constant 127 : i32
    %11 = tpu.dynamic_rotate %0 by %c127_i32 dim 1 : vector<8x128xf32>, i32 -> vector<8x128xf32>
    %12 = arith.addf %10, %11 : vector<8x128xf32>
    %cst_5 = arith.constant 4.687500e-02 : f32
    %13 = vector.broadcast %cst_5 : f32 to vector<8x128xf32>
    %14 = arith.mulf %13, %12 : vector<8x128xf32>
    %15 = arith.addf %9, %14 : vector<8x128xf32>
    %c2_i32 = arith.constant 2 : i32
    %16 = tpu.dynamic_rotate %0 by %c2_i32 dim 1 : vector<8x128xf32>, i32 -> vector<8x128xf32>
    %c126_i32 = arith.constant 126 : i32
    %17 = tpu.dynamic_rotate %0 by %c126_i32 dim 1 : vector<8x128xf32>, i32 -> vector<8x128xf32>
    %18 = arith.addf %16, %17 : vector<8x128xf32>
    %cst_6 = arith.constant -4.687500e-03 : f32
    %19 = vector.broadcast %cst_6 : f32 to vector<8x128xf32>
    %20 = arith.mulf %19, %18 : vector<8x128xf32>
    %21 = arith.addf %15, %20 : vector<8x128xf32>
    %c3_i32 = arith.constant 3 : i32
    %22 = tpu.dynamic_rotate %0 by %c3_i32 dim 1 : vector<8x128xf32>, i32 -> vector<8x128xf32>
    %c125_i32 = arith.constant 125 : i32
    %23 = tpu.dynamic_rotate %0 by %c125_i32 dim 1 : vector<8x128xf32>, i32 -> vector<8x128xf32>
    %24 = vector.broadcast %3 : vector<1x128xf32> to vector<8x128xf32>
    %25 = arith.mulf %22, %24 : vector<8x128xf32>
    %26 = vector.broadcast %4 : vector<1x128xf32> to vector<8x128xf32>
    %27 = arith.mulf %23, %26 : vector<8x128xf32>
    %28 = arith.addf %25, %27 : vector<8x128xf32>
    %cst_7 = arith.constant 3.47222231E-4 : f32
    %29 = vector.broadcast %cst_7 : f32 to vector<8x128xf32>
    %30 = arith.mulf %29, %28 : vector<8x128xf32>
    %31 = arith.addf %21, %30 : vector<8x128xf32>
    %32 = vector.broadcast %5 : vector<1x128xf32> to vector<8x128xf32>
    %33 = arith.mulf %31, %32 : vector<8x128xf32>
    %34 = vector.broadcast %6 : vector<1x128xf32> to vector<8x128xf32>
    %35 = arith.mulf %1, %34 : vector<8x128xf32>
    %36 = arith.subf %33, %35 : vector<8x128xf32>
    %37 = arith.subf %0, %1 : vector<8x128xf32>
    %38 = arith.mulf %36, %36 : vector<8x128xf32>
    %39 = arith.mulf %37, %37 : vector<8x128xf32>
    %40 = vector.broadcast %7 : vector<1x128xf32> to vector<8x128xf32>
    %41 = arith.mulf %40, %39 : vector<8x128xf32>
    %42 = arith.addf %38, %41 : vector<8x128xf32>
    %cst_8 = arith.constant dense<0.000000e+00> : vector<128xf32>
    %43 = vector.multi_reduction <add>, %42, %cst_8 [0] : vector<8x128xf32> to vector<128xf32>
    %44 = vector.shape_cast %43 : vector<128xf32> to vector<1x128xf32>
    %45 = vector.shape_cast %44 : vector<1x128xf32> to vector<1x1x128xf32>
    %c0_9 = arith.constant 0 : index
    %c0_10 = arith.constant 0 : index
    %c0_11 = arith.constant 0 : index
    %46 = vector.load %arg4[%c0_9, %c0_10, %c0_11] : memref<1x1x128xf32, #tpu.memory_space<vmem>>, vector<1x1x128xf32>
    tpu.vector_store %arg4[%c0_9, %c0_10, %c0_11], %45 {strides = array<i32>} : memref<1x1x128xf32, #tpu.memory_space<vmem>>, vector<1x1x128xf32>,
    return
  }
  func.func @transform_0(%arg0: i32) -> (i32, i32) {
    %c0_i32 = arith.constant 0 : i32
    %c0_i32_0 = arith.constant 0 : i32
    %c0_i32_1 = arith.constant 0 : i32
    return %c0_i32, %c0_i32_0 : i32, i32
  }
  func.func @transform_1(%arg0: i32) -> (i32, i32) {
    %c0_i32 = arith.constant 0 : i32
    %c0_i32_0 = arith.constant 0 : i32
    return %arg0, %c0_i32 : i32, i32
  }
  func.func @transform_2(%arg0: i32) -> (i32, i32) {
    %c0_i32 = arith.constant 0 : i32
    %c0_i32_0 = arith.constant 0 : i32
    return %arg0, %c0_i32 : i32, i32
  }
  func.func @transform_3(%arg0: i32) -> (i32, i32, i32) {
    %c0_i32 = arith.constant 0 : i32
    %c0_i32_0 = arith.constant 0 : i32
    %c0_i32_1 = arith.constant 0 : i32
    return %arg0, %c0_i32, %c0_i32_0 : i32, i32, i32
  }
}

</mosaic_0001>

<bundles_post_ra>
// kernel: loss_fn.1
= control target key start
LH: loop header
LB: loop body
LE: loop exit
PB: predicated region body
PF: predicated region fallthrough
CT: control target
= control target key end

     0   :  { %8 = vsyncpa [#allocation3], 0  ;;  %s198_s0 = inlined_call_operand.vmem [shape: f32[8,128], index: 0, kind: input, shape index: {}]   ;;  %s199_s1 = inlined_call_operand.hbm [shape: f32[8,128], index: 1, kind: input, shape index: {}]   ;;  %s200_s2 = inlined_call_operand.hbm [shape: f32[8,128], index: 2, kind: input, shape index: {}]   ;;  %s201_s3 = inlined_call_operand.vmem [shape: f32[1,1,128], index: 3, kind: output, shape index: {}]  }
   0x1   :  { %9 = vsyncpa [#allocation5], 0  ;;  %s158_s12 = smov [#allocation2]   ;;  %s159_s14 = smov [#allocation4]  }
   0x2   :  { %s18_s13 = sshll.u32 %s158_s12, 4  ;;  %s28_s15 = sshll.u32 %s159_s14, 4  ;;  %s19_s13 = int_to_ptr.vmem [resolvable:$true] %s18_s13  ;;  %s29_s15 = int_to_ptr.vmem [resolvable:$true] %s28_s15 }
   0x3   :  { %s122_s16 = scalar_lea.vmem %s19_s13, 128  ;;  %p127_p1 = scmp.lt.s32.totalorder %s19_s13, %s19_s13 }
   0x4   :  { %p123_p0 = scmp.ne.s32.totalorder %s19_s13, %s122_s16  ;;  %p128_p2 = scmp.lt.s32.totalorder %s122_s16, %s122_s16 }
   0x6   :  { %p129_p3 = por %p128_p2, %p127_p1 }
   0x8   :  { %p130_p4 = pnand %p129_p3, %p123_p0 }
   0xa   :  { %133 = shalt.err (!%p130_p4)
}
   0xb   :  { %21 = dma.hbm_to_vmem [thread:$0]  %s199_s1, 128, %s19_s13, [#allocation3]  }
   0xc   :  { %s142_s19 = scalar_lea.vmem %s29_s15, 128  ;;  %p147_p6 = scmp.lt.s32.totalorder %s29_s15, %s29_s15 }
   0xd   :  { %p143_p5 = scmp.ne.s32.totalorder %s29_s15, %s142_s19  ;;  %p148_p7 = scmp.lt.s32.totalorder %s142_s19, %s142_s19 }
   0xf   :  { %p149_p8 = por %p148_p7, %p147_p6 }
  0x11   :  { %p150_p9 = pnand %p149_p8, %p143_p5 }
  0x13   :  { %153 = shalt.err (!%p150_p9)
}
  0x14   :  { %31 = dma.hbm_to_vmem [thread:$0]  %s200_s2, 128, %s29_s15, [#allocation5]  }
  0x15   :  { %154 = dma.done.wait [#allocation3], 128  }
  0x16   :  { %155 = vsyncadd [#allocation3], 4294967168 }
  0x17   :  { %156 = dma.done.wait [#allocation5], 128  }
  0x18   :  { %157 = vsyncadd [#allocation5], 4294967168  ;;  %v38_v0 = vld [vmem:[#allocation2] sm:$0xff]  ;;  %s160_s22 = smov 2   ;;  %s161_s23 = smov 1   ;;  %v60_v1 = vlaneseq  ;;  %v39_v18 = vld [vmem:[#allocation4] sm:$0xff] }
  0x19   :  { %49 = vrot.lane.b32.xlu1 %v38_v0, %s160_s22  ;;  %42 = vrot.lane.b32.xlu0 %v38_v0, %s161_s23  ;;  %s162_s1 = smov 126   ;;  %s163_s24 = smov 127   ;;  %v40_v7 = vld [vmem:[%s198_s0] sm:$0xff]  ;;  %v41_v10 = vmul.f32 -0.08506945, %v38_v0  ;;  %v84_v28 = vsub.f32 %v38_v0, %v39_v18 }
  0x1a   :  { %s164_s25 = smov 125   ;;  %s165_s26 = smov 3   ;;  %v61_v2 = vshrl.u32 %v60_v1, 7 }
  0x1b   :  { %v86_v35 = vmul.f32 %v84_v28, %v84_v28 }
  0x1c   :  { %v67_v5 = vsub.s32 1, %v61_v2  ;;  %v62_v6 = vsub.s32 0, %v61_v2  ;;  %v80_v16 = vsub.s32 3, %v61_v2  ;;  %v75_v22 = vsub.s32 2, %v61_v2 }
  0x1d   :  { %51 = vrot.lane.b32.xlu1 %v38_v0, %s162_s1  ;;  %44 = vrot.lane.b32.xlu0 %v38_v0, %s163_s24  ;;  %v89_v24 = vsub.s32 4, %v61_v2 }
  0x1e   :  { %v68_v12 = vrot.slane %v40_v7, %v67_v5  ;;  %v63_v13 = vrot.slane %v40_v7, %v62_v6  ;;  %v81_v26 = vrot.slane %v40_v7, %v80_v16  ;;  %v76_v30 = vrot.slane %v40_v7, %v75_v22 }
  0x1f   :  { %v90_v32 = vrot.slane %v40_v7, %v89_v24 }
  0x20   :  { %v82_v33 = vmul.f32 %v81_v26, %v39_v18 }
  0x21   :  { %58 = vrot.lane.b32.xlu1 %v38_v0, %s164_s25  ;;  %56 = vrot.lane.b32.xlu0 %v38_v0, %s165_s26  ;;  %v91_v38 = vmul.f32 %v90_v32, %v86_v35 }
  0x8b   :  { %v50_v3 = vpop.permute.xlu1 %49  ;;  %v43_v4 = vpop.permute.xlu0 %42 }
  0x8f   :  { %v52_v8 = vpop.permute.xlu1 %51  ;;  %v45_v9 = vpop.permute.xlu0 %44 }
  0x90   :  { %v46_v11 = vadd.f32 %v45_v9, %v43_v4  ;;  %v53_v14 = vadd.f32 %v52_v8, %v50_v3 }
  0x92   :  { %v47_v15 = vmul.f32 0.046875, %v46_v11  ;;  %v54_v25 = vmul.f32 -0.0046875, %v53_v14 }
  0x93   :  { %v59_v17 = vpop.permute.xlu1 %58  ;;  %v57_v19 = vpop.permute.xlu0 %56 }
  0x94   :  { %v48_v20 = vadd.f32 %v47_v15, %v41_v10  ;;  %v69_v21 = vmul.f32 %v68_v12, %v59_v17  ;;  %v64_v23 = vmul.f32 %v63_v13, %v57_v19 }
  0x96   :  { %v70_v27 = vadd.f32 %v69_v21, %v64_v23  ;;  %v55_v29 = vadd.f32 %v54_v25, %v48_v20 }
  0x98   :  { %v71_v31 = vmul.f32 0.00034722223, %v70_v27 }
  0x9a   :  { %v72_v34 = vadd.f32 %v71_v31, %v55_v29 }
  0x9c   :  { %v77_v36 = vmul.f32 %v76_v30, %v72_v34 }
  0x9e   :  { %v83_v37 = vsub.f32 %v77_v36, %v82_v33 }
  0xa0   :  { %v85_v39 = vmul.f32 %v83_v37, %v83_v37 }
  0xa2   :  { %v92_v40 = vadd.f32 %v91_v38, %v85_v39 }
  0xa4   :  { %v93_v41 = vrot.slane %v92_v40, 4 }
  0xa6   :  { %v94_v42 = vadd.f32 %v93_v41, %v92_v40 }
  0xa8   :  { %v95_v43 = vrot.slane %v94_v42, 2 }
  0xaa   :  { %v96_v44 = vadd.f32 %v95_v43, %v94_v42 }
  0xac   :  { %v97_v45 = vrot.slane %v96_v44, 1 }
  0xae   :  { %v98_v46 = vadd.f32 %v97_v45, %v96_v44 }
  0xb0   :  { %99 = vst [vmem:[%s201_s3] sm:$0x1] %v98_v46 }
  0xb1   :  { %104 = vsyncpa [#allocation3], 1 }
  0xb2   :  { %105 = vsyncpa [#allocation5], 1 }

</bundles_post_ra>
